<compile_context>
chip_gen: v6e
topology: v6e:2x2x1
jax: 0.10.0
libtpu: 0.0.40
codegen_flags: <defaults>
</compile_context>

<pallas_src>
import functools

import jax
import jax.numpy as jnp
from jax.experimental import pallas as pl
from jax.experimental.pallas import tpu as pltpu


_WINDOW = 8  # in-flight row DMAs per grid step (power of two)


def _gather_kernel(ids_ref, table_ref, out_ref, buf_ref, sem_ref):
    # ids_ref:   (N_pad,)   int32 in SMEM (scalar-prefetched flattened indices)
    # table_ref: (V, D)     float32 in HBM (memory_space=pl.ANY)
    # out_ref:   (TM, D)    float32 VMEM output block
    # buf_ref:   (TM, D)    float32 VMEM scratch (DMA landing buffer)
    # sem_ref:   (_WINDOW,) DMA semaphores
    i = pl.program_id(0)
    tm = out_ref.shape[0]
    base = i * tm

    def row_copy(j):
        row = ids_ref[base + j]
        return pltpu.make_async_copy(
            table_ref.at[pl.ds(row, 1), :],
            buf_ref.at[pl.ds(j, 1), :],
            sem_ref.at[j & (_WINDOW - 1)],
        )

    # Prime the DMA window.
    for j in range(min(_WINDOW, tm)):
        row_copy(j).start()

    # Steady state: wait for row j, then start row j + _WINDOW (same sem slot).
    def body(j, carry):
        row_copy(j).wait()

        @pl.when(j + _WINDOW < tm)
        def _():
            row_copy(j + _WINDOW).start()

        return carry

    jax.lax.fori_loop(0, tm, body, 0)

    # Dense (lane-aligned) store of the gathered tile.
    out_ref[...] = buf_ref[...]


@functools.partial(jax.jit, static_argnames=("tile_m",))
def bank_embedding_forward(indices, table, *, tile_m=256):
    """indices: int array (any shape) with values in [0, V); table: (V, D) f32.

    Returns float32 of shape indices.shape + (D,), matching nn.Embedding(indices).
    """
    v, d = table.shape
    idx_shape = indices.shape
    n = 1
    for s in idx_shape:
        n *= s

    # TILE_M: multiple of 8, no larger than the (8-rounded) problem so tiny
    # inputs (like the demo) need no padding and no post-kernel slice.
    n_rounded = ((n + 7) // 8) * 8
    tm = max(8, min((int(tile_m) // 8) * 8, n_rounded))
    n_pad = ((n + tm - 1) // tm) * tm

    idx_flat = indices.reshape(n).astype(jnp.int32)
    # Clamp keeps the row DMA in bounds (torch.nn.Embedding raises on OOB;
    # untrusted inputs are clamped here instead of faulting the DMA).
    idx_flat = jnp.clip(idx_flat, 0, v - 1)
    if n_pad != n:
        idx_flat = jnp.pad(idx_flat, (0, n_pad - n))  # padded rows gather row 0

    # Gather is pure memory traffic: read N*D*4 from the table, write N*D*4,
    # plus the index stream.
    cost = pl.CostEstimate(
        flops=0,
        transcendentals=0,
        bytes_accessed=int(n_pad * d * 4 * 2 + n_pad * 4),
    )

    # VMEM budget: double-buffered (TM, D) output block + (TM, D) scratch with
    # headroom; capped well under v7x's 64 MiB physical VMEM.
    vmem_limit = int(min(48 * 1024 * 1024,
                         max(4 * 1024 * 1024, 6 * tm * d * 4)))

    out = pl.pallas_call(
        _gather_kernel,
        out_shape=jax.ShapeDtypeStruct((n_pad, d), table.dtype),
        grid_spec=pltpu.PrefetchScalarGridSpec(
            num_scalar_prefetch=1,
            grid=(n_pad // tm,),
            in_specs=[pl.BlockSpec(memory_space=pl.ANY)],   # table stays in HBM
            out_specs=pl.BlockSpec((tm, d), lambda i, ids: (i, 0)),
            scratch_shapes=[
                pltpu.VMEM((tm, d), table.dtype),
                pltpu.SemaphoreType.DMA((_WINDOW,)),
            ],
        ),
        compiler_params=pltpu.CompilerParams(
            dimension_semantics=("parallel",),   # shard row tiles across v7x TCs
            vmem_limit_bytes=vmem_limit,
        ),
        cost_estimate=cost,
    )(idx_flat, table)

    if n_pad != n:
        out = out[:n]
    return out.reshape(idx_shape + (d,))


if __name__ == "__main__":
    # Small shapes consistent with the module's __init__:
    #   total_bank_tokens = V, d_model = D; (B, S) prompt-token lookup.
    V = 16    # total_bank_tokens
    D = 128   # d_model (multiple of 128 -> lane-dense output stores)
    B = 2
    S = 8

    key = jax.random.PRNGKey(0)
    k_w, k_i = jax.random.split(key)
    bank_weight = jax.random.normal(k_w, (V, D), dtype=jnp.float32)
    indices = jax.random.randint(k_i, (B, S), 0, V, dtype=jnp.int32)

    out = bank_embedding_forward(indices, bank_weight)
    out = jax.block_until_ready(out)

    # Reference: plain gather (exactly what nn.Embedding does).
    ref = jnp.take(bank_weight, indices.reshape(-1), axis=0).reshape(B, S, D)
    assert out.shape == (B, S, D)
    assert out.dtype == jnp.float32
    assert jnp.array_equal(out, ref), "mismatch vs. reference gather"

    # Also exercise the 1-D bank_tokens lookup used by BankT5Single.get_prompt.
    bank_tokens = jnp.arange(V, dtype=jnp.int32)
    out_bank = jax.block_until_ready(bank_embedding_forward(bank_tokens, bank_weight))
    assert out_bank.shape == (V, D)
    assert jnp.array_equal(out_bank, bank_weight), "bank_tokens lookup mismatch"

    print("KERNEL_OK")
</pallas_src>

<mosaic_0001>
module attributes {stable_mosaic.version = 11 : i64} {
  func.func @_gather_kernel(%arg0: i32, %arg1: memref<16xi32, #tpu.memory_space<smem>>, %arg2: memref<16x128xf32, #tpu.memory_space<any>>, %arg3: memref<16x128xf32, #tpu.memory_space<vmem>>, %arg4: memref<16x128xf32, #tpu.memory_space<vmem>>, %arg5: memref<8x!tpu.dma_semaphore, #tpu.memory_space<semaphore_mem>>) attributes {dimension_semantics = [#tpu.dimension_semantics<parallel>], iteration_bounds = array<i64: 1>, scalar_prefetch = 1 : i64, scratch_operands = 2 : i64, tpu.core_type = #tpu.core_type<tc>, window_params = [{}, {transform_indices = @transform_1, window_bounds = array<i64: 16, 128>}]} {
    %c16_i32 = arith.constant 16 : i32
    %0 = arith.muli %arg0, %c16_i32 : i32
    %c0_i32 = arith.constant 0 : i32
    %1 = arith.addi %0, %c0_i32 : i32
    %2 = arith.index_cast %1 : i32 to index
    %3 = memref.load %arg1[%2] : memref<16xi32, #tpu.memory_space<smem>>
    %c0_i32_0 = arith.constant 0 : i32
    %c0_i32_1 = arith.constant 0 : i32
    %4 = tpu.memref_slice %arg2[%3, %c0_i32_1] : memref<16x128xf32, #tpu.memory_space<any>> -> memref<1x128xf32, #tpu.memory_space<any>>
    %c0_i32_2 = arith.constant 0 : i32
    %c0_i32_3 = arith.constant 0 : i32
    %5 = tpu.memref_slice %arg4[%c0_i32_2, %c0_i32_3] : memref<16x128xf32, #tpu.memory_space<vmem>> -> memref<1x128xf32, #tpu.memory_space<vmem>>
    %6 = tpu.memref_slice %arg5[%c0_i32_0] : memref<8x!tpu.dma_semaphore, #tpu.memory_space<semaphore_mem>> -> memref<1x!tpu.dma_semaphore, #tpu.memory_space<semaphore_mem>>
    %7 = tpu.memref_squeeze %6 : memref<1x!tpu.dma_semaphore, #tpu.memory_space<semaphore_mem>> -> memref<!tpu.dma_semaphore, #tpu.memory_space<semaphore_mem>>
    tpu.enqueue_dma source(%4 : memref<1x128xf32, #tpu.memory_space<any>>) target(%5 : memref<1x128xf32, #tpu.memory_space<vmem>>) target_semaphore(%7 : memref<!tpu.dma_semaphore, #tpu.memory_space<semaphore_mem>>)
    %c1_i32 = arith.constant 1 : i32
    %8 = arith.addi %0, %c1_i32 : i32
    %9 = arith.index_cast %8 : i32 to index
    %10 = memref.load %arg1[%9] : memref<16xi32, #tpu.memory_space<smem>>
    %c1_i32_4 = arith.constant 1 : i32
    %c0_i32_5 = arith.constant 0 : i32
    %11 = tpu.memref_slice %arg2[%10, %c0_i32_5] : memref<16x128xf32, #tpu.memory_space<any>> -> memref<1x128xf32, #tpu.memory_space<any>>
    %c1_i32_6 = arith.constant 1 : i32
    %c0_i32_7 = arith.constant 0 : i32
    %12 = tpu.memref_slice %arg4[%c1_i32_6, %c0_i32_7] : memref<16x128xf32, #tpu.memory_space<vmem>> -> memref<1x128xf32, #tpu.memory_space<vmem>>
    %13 = tpu.memref_slice %arg5[%c1_i32_4] : memref<8x!tpu.dma_semaphore, #tpu.memory_space<semaphore_mem>> -> memref<1x!tpu.dma_semaphore, #tpu.memory_space<semaphore_mem>>
    %14 = tpu.memref_squeeze %13 : memref<1x!tpu.dma_semaphore, #tpu.memory_space<semaphore_mem>> -> memref<!tpu.dma_semaphore, #tpu.memory_space<semaphore_mem>>
    tpu.enqueue_dma source(%11 : memref<1x128xf32, #tpu.memory_space<any>>) target(%12 : memref<1x128xf32, #tpu.memory_space<vmem>>) target_semaphore(%14 : memref<!tpu.dma_semaphore, #tpu.memory_space<semaphore_mem>>)
    %c2_i32 = arith.constant 2 : i32
    %15 = arith.addi %0, %c2_i32 : i32
    %16 = arith.index_cast %15 : i32 to index
    %17 = memref.load %arg1[%16] : memref<16xi32, #tpu.memory_space<smem>>
    %c2_i32_8 = arith.constant 2 : i32
    %c0_i32_9 = arith.constant 0 : i32
    %18 = tpu.memref_slice %arg2[%17, %c0_i32_9] : memref<16x128xf32, #tpu.memory_space<any>> -> memref<1x128xf32, #tpu.memory_space<any>>
    %c2_i32_10 = arith.constant 2 : i32
    %c0_i32_11 = arith.constant 0 : i32
    %19 = tpu.memref_slice %arg4[%c2_i32_10, %c0_i32_11] : memref<16x128xf32, #tpu.memory_space<vmem>> -> memref<1x128xf32, #tpu.memory_space<vmem>>
    %20 = tpu.memref_slice %arg5[%c2_i32_8] : memref<8x!tpu.dma_semaphore, #tpu.memory_space<semaphore_mem>> -> memref<1x!tpu.dma_semaphore, #tpu.memory_space<semaphore_mem>>
    %21 = tpu.memref_squeeze %20 : memref<1x!tpu.dma_semaphore, #tpu.memory_space<semaphore_mem>> -> memref<!tpu.dma_semaphore, #tpu.memory_space<semaphore_mem>>
    tpu.enqueue_dma source(%18 : memref<1x128xf32, #tpu.memory_space<any>>) target(%19 : memref<1x128xf32, #tpu.memory_space<vmem>>) target_semaphore(%21 : memref<!tpu.dma_semaphore, #tpu.memory_space<semaphore_mem>>)
    %c3_i32 = arith.constant 3 : i32
    %22 = arith.addi %0, %c3_i32 : i32
    %23 = arith.index_cast %22 : i32 to index
    %24 = memref.load %arg1[%23] : memref<16xi32, #tpu.memory_space<smem>>
    %c3_i32_12 = arith.constant 3 : i32
    %c0_i32_13 = arith.constant 0 : i32
    %25 = tpu.memref_slice %arg2[%24, %c0_i32_13] : memref<16x128xf32, #tpu.memory_space<any>> -> memref<1x128xf32, #tpu.memory_space<any>>
    %c3_i32_14 = arith.constant 3 : i32
    %c0_i32_15 = arith.constant 0 : i32
    %26 = tpu.memref_slice %arg4[%c3_i32_14, %c0_i32_15] : memref<16x128xf32, #tpu.memory_space<vmem>> -> memref<1x128xf32, #tpu.memory_space<vmem>>
    %27 = tpu.memref_slice %arg5[%c3_i32_12] : memref<8x!tpu.dma_semaphore, #tpu.memory_space<semaphore_mem>> -> memref<1x!tpu.dma_semaphore, #tpu.memory_space<semaphore_mem>>
    %28 = tpu.memref_squeeze %27 : memref<1x!tpu.dma_semaphore, #tpu.memory_space<semaphore_mem>> -> memref<!tpu.dma_semaphore, #tpu.memory_space<semaphore_mem>>
    tpu.enqueue_dma source(%25 : memref<1x128xf32, #tpu.memory_space<any>>) target(%26 : memref<1x128xf32, #tpu.memory_space<vmem>>) target_semaphore(%28 : memref<!tpu.dma_semaphore, #tpu.memory_space<semaphore_mem>>)
    %c4_i32 = arith.constant 4 : i32
    %29 = arith.addi %0, %c4_i32 : i32
    %30 = arith.index_cast %29 : i32 to index
    %31 = memref.load %arg1[%30] : memref<16xi32, #tpu.memory_space<smem>>
    %c4_i32_16 = arith.constant 4 : i32
    %c0_i32_17 = arith.constant 0 : i32
    %32 = tpu.memref_slice %arg2[%31, %c0_i32_17] : memref<16x128xf32, #tpu.memory_space<any>> -> memref<1x128xf32, #tpu.memory_space<any>>
    %c4_i32_18 = arith.constant 4 : i32
    %c0_i32_19 = arith.constant 0 : i32
    %33 = tpu.memref_slice %arg4[%c4_i32_18, %c0_i32_19] : memref<16x128xf32, #tpu.memory_space<vmem>> -> memref<1x128xf32, #tpu.memory_space<vmem>>
    %34 = tpu.memref_slice %arg5[%c4_i32_16] : memref<8x!tpu.dma_semaphore, #tpu.memory_space<semaphore_mem>> -> memref<1x!tpu.dma_semaphore, #tpu.memory_space<semaphore_mem>>
    %35 = tpu.memref_squeeze %34 : memref<1x!tpu.dma_semaphore, #tpu.memory_space<semaphore_mem>> -> memref<!tpu.dma_semaphore, #tpu.memory_space<semaphore_mem>>
    tpu.enqueue_dma source(%32 : memref<1x128xf32, #tpu.memory_space<any>>) target(%33 : memref<1x128xf32, #tpu.memory_space<vmem>>) target_semaphore(%35 : memref<!tpu.dma_semaphore, #tpu.memory_space<semaphore_mem>>)
    %c5_i32 = arith.constant 5 : i32
    %36 = arith.addi %0, %c5_i32 : i32
    %37 = arith.index_cast %36 : i32 to index
    %38 = memref.load %arg1[%37] : memref<16xi32, #tpu.memory_space<smem>>
    %c5_i32_20 = arith.constant 5 : i32
    %c0_i32_21 = arith.constant 0 : i32
    %39 = tpu.memref_slice %arg2[%38, %c0_i32_21] : memref<16x128xf32, #tpu.memory_space<any>> -> memref<1x128xf32, #tpu.memory_space<any>>
    %c5_i32_22 = arith.constant 5 : i32
    %c0_i32_23 = arith.constant 0 : i32
    %40 = tpu.memref_slice %arg4[%c5_i32_22, %c0_i32_23] : memref<16x128xf32, #tpu.memory_space<vmem>> -> memref<1x128xf32, #tpu.memory_space<vmem>>
    %41 = tpu.memref_slice %arg5[%c5_i32_20] : memref<8x!tpu.dma_semaphore, #tpu.memory_space<semaphore_mem>> -> memref<1x!tpu.dma_semaphore, #tpu.memory_space<semaphore_mem>>
    %42 = tpu.memref_squeeze %41 : memref<1x!tpu.dma_semaphore, #tpu.memory_space<semaphore_mem>> -> memref<!tpu.dma_semaphore, #tpu.memory_space<semaphore_mem>>
    tpu.enqueue_dma source(%39 : memref<1x128xf32, #tpu.memory_space<any>>) target(%40 : memref<1x128xf32, #tpu.memory_space<vmem>>) target_semaphore(%42 : memref<!tpu.dma_semaphore, #tpu.memory_space<semaphore_mem>>)
    %c6_i32 = arith.constant 6 : i32
    %43 = arith.addi %0, %c6_i32 : i32
    %44 = arith.index_cast %43 : i32 to index
    %45 = memref.load %arg1[%44] : memref<16xi32, #tpu.memory_space<smem>>
    %c6_i32_24 = arith.constant 6 : i32
    %c0_i32_25 = arith.constant 0 : i32
    %46 = tpu.memref_slice %arg2[%45, %c0_i32_25] : memref<16x128xf32, #tpu.memory_space<any>> -> memref<1x128xf32, #tpu.memory_space<any>>
    %c6_i32_26 = arith.constant 6 : i32
    %c0_i32_27 = arith.constant 0 : i32
    %47 = tpu.memref_slice %arg4[%c6_i32_26, %c0_i32_27] : memref<16x128xf32, #tpu.memory_space<vmem>> -> memref<1x128xf32, #tpu.memory_space<vmem>>
    %48 = tpu.memref_slice %arg5[%c6_i32_24] : memref<8x!tpu.dma_semaphore, #tpu.memory_space<semaphore_mem>> -> memref<1x!tpu.dma_semaphore, #tpu.memory_space<semaphore_mem>>
    %49 = tpu.memref_squeeze %48 : memref<1x!tpu.dma_semaphore, #tpu.memory_space<semaphore_mem>> -> memref<!tpu.dma_semaphore, #tpu.memory_space<semaphore_mem>>
    tpu.enqueue_dma source(%46 : memref<1x128xf32, #tpu.memory_space<any>>) target(%47 : memref<1x128xf32, #tpu.memory_space<vmem>>) target_semaphore(%49 : memref<!tpu.dma_semaphore, #tpu.memory_space<semaphore_mem>>)
    %c7_i32 = arith.constant 7 : i32
    %50 = arith.addi %0, %c7_i32 : i32
    %51 = arith.index_cast %50 : i32 to index
    %52 = memref.load %arg1[%51] : memref<16xi32, #tpu.memory_space<smem>>
    %c7_i32_28 = arith.constant 7 : i32
    %c0_i32_29 = arith.constant 0 : i32
    %53 = tpu.memref_slice %arg2[%52, %c0_i32_29] : memref<16x128xf32, #tpu.memory_space<any>> -> memref<1x128xf32, #tpu.memory_space<any>>
    %c7_i32_30 = arith.constant 7 : i32
    %c0_i32_31 = arith.constant 0 : i32
    %54 = tpu.memref_slice %arg4[%c7_i32_30, %c0_i32_31] : memref<16x128xf32, #tpu.memory_space<vmem>> -> memref<1x128xf32, #tpu.memory_space<vmem>>
    %55 = tpu.memref_slice %arg5[%c7_i32_28] : memref<8x!tpu.dma_semaphore, #tpu.memory_space<semaphore_mem>> -> memref<1x!tpu.dma_semaphore, #tpu.memory_space<semaphore_mem>>
    %56 = tpu.memref_squeeze %55 : memref<1x!tpu.dma_semaphore, #tpu.memory_space<semaphore_mem>> -> memref<!tpu.dma_semaphore, #tpu.memory_space<semaphore_mem>>
    tpu.enqueue_dma source(%53 : memref<1x128xf32, #tpu.memory_space<any>>) target(%54 : memref<1x128xf32, #tpu.memory_space<vmem>>) target_semaphore(%56 : memref<!tpu.dma_semaphore, #tpu.memory_space<semaphore_mem>>)
    %c0_i32_32 = arith.constant 0 : i32
    %c16_i32_33 = arith.constant 16 : i32
    %57 = arith.addi %c0_i32_32, %c16_i32_33 : i32
    %c1_i32_34 = arith.constant 1 : i32
    scf.for %arg6 = %c0_i32_32 to %57 step %c1_i32_34  : i32 {
      %60 = arith.addi %0, %arg6 : i32
      %61 = arith.index_cast %60 : i32 to index
      %62 = memref.load %arg1[%61] : memref<16xi32, #tpu.memory_space<smem>>
      %c7_i32_39 = arith.constant 7 : i32
      %63 = arith.andi %arg6, %c7_i32_39 : i32
      %c0_i32_40 = arith.constant 0 : i32
      %64 = tpu.memref_slice %arg2[%62, %c0_i32_40] : memref<16x128xf32, #tpu.memory_space<any>> -> memref<1x128xf32, #tpu.memory_space<any>>
      %c0_i32_41 = arith.constant 0 : i32
      %65 = tpu.memref_slice %arg4[%arg6, %c0_i32_41] : memref<16x128xf32, #tpu.memory_space<vmem>> -> memref<1x128xf32, #tpu.memory_space<vmem>>
      %66 = tpu.memref_slice %arg5[%63] : memref<8x!tpu.dma_semaphore, #tpu.memory_space<semaphore_mem>> -> memref<1x!tpu.dma_semaphore, #tpu.memory_space<semaphore_mem>>
      %67 = tpu.memref_squeeze %66 : memref<1x!tpu.dma_semaphore, #tpu.memory_space<semaphore_mem>> -> memref<!tpu.dma_semaphore, #tpu.memory_space<semaphore_mem>>
      tpu.wait_dma2 semaphore(%67 : memref<!tpu.dma_semaphore, #tpu.memory_space<semaphore_mem>>) src(%64 : memref<1x128xf32, #tpu.memory_space<any>>) dst(%65 : memref<1x128xf32, #tpu.memory_space<vmem>>)
      %c8_i32 = arith.constant 8 : i32
      %68 = arith.addi %arg6, %c8_i32 : i32
      %c16_i32_42 = arith.constant 16 : i32
      %69 = arith.cmpi slt, %68, %c16_i32_42 : i32
      %70 = arith.extui %69 : i1 to i32
      %c0_i32_43 = arith.constant 0 : i32
      %71 = arith.cmpi ne, %70, %c0_i32_43 : i32
      scf.if %71 {
        %c8_i32_44 = arith.constant 8 : i32
        %72 = arith.addi %arg6, %c8_i32_44 : i32
        %73 = arith.addi %0, %72 : i32
        %74 = arith.index_cast %73 : i32 to index
        %75 = memref.load %arg1[%74] : memref<16xi32, #tpu.memory_space<smem>>
        %c7_i32_45 = arith.constant 7 : i32
        %76 = arith.andi %72, %c7_i32_45 : i32
        %c0_i32_46 = arith.constant 0 : i32
        %77 = tpu.memref_slice %arg2[%75, %c0_i32_46] : memref<16x128xf32, #tpu.memory_space<any>> -> memref<1x128xf32, #tpu.memory_space<any>>
        %c0_i32_47 = arith.constant 0 : i32
        %78 = tpu.memref_slice %arg4[%72, %c0_i32_47] : memref<16x128xf32, #tpu.memory_space<vmem>> -> memref<1x128xf32, #tpu.memory_space<vmem>>
        %79 = tpu.memref_slice %arg5[%76] : memref<8x!tpu.dma_semaphore, #tpu.memory_space<semaphore_mem>> -> memref<1x!tpu.dma_semaphore, #tpu.memory_space<semaphore_mem>>
        %80 = tpu.memref_squeeze %79 : memref<1x!tpu.dma_semaphore, #tpu.memory_space<semaphore_mem>> -> memref<!tpu.dma_semaphore, #tpu.memory_space<semaphore_mem>>
        tpu.enqueue_dma source(%77 : memref<1x128xf32, #tpu.memory_space<any>>) target(%78 : memref<1x128xf32, #tpu.memory_space<vmem>>) target_semaphore(%80 : memref<!tpu.dma_semaphore, #tpu.memory_space<semaphore_mem>>)
      } else {
      }
    }
    %c16_i32_35 = arith.constant 16 : i32
    %c0 = arith.constant 0 : index
    %c0_36 = arith.constant 0 : index
    %58 = vector.load %arg4[%c0, %c0_36] : memref<16x128xf32, #tpu.memory_space<vmem>>, vector<16x128xf32>
    %c0_37 = arith.constant 0 : index
    %c0_38 = arith.constant 0 : index
    %59 = vector.load %arg3[%c0_37, %c0_38] : memref<16x128xf32, #tpu.memory_space<vmem>>, vector<16x128xf32>
    tpu.vector_store %arg3[%c0_37, %c0_38], %58 {strides = array<i32>} : memref<16x128xf32, #tpu.memory_space<vmem>>, vector<16x128xf32>,
    return
  }
  func.func @transform_1(%arg0: i32, %arg1: memref<16xi32, #tpu.memory_space<smem>>) -> (i32, i32) {
    %c0_i32 = arith.constant 0 : i32
    %c0_i32_0 = arith.constant 0 : i32
    return %arg0, %c0_i32 : i32, i32
  }
}

</mosaic_0001>

<bundles_post_ra>
// kernel: bank_embedding_forward.1
= control target key start
LH: loop header
LB: loop body
LE: loop exit
PB: predicated region body
PF: predicated region fallthrough
CT: control target
= control target key end

     0   :  { %s774_s0 = inlined_call_operand.vmem [shape: s32[16], index: 0, kind: input, shape index: {}]   ;;  %s775_s1 = inlined_call_operand.hbm [shape: f32[16,128], index: 1, kind: input, shape index: {}]   ;;  %s776_s2 = inlined_call_operand.hbm [shape: f32[16,128], index: 2, kind: output, shape index: {}]  }
   0x1   :  { %s7_s11 = sshll.u32 %s774_s0, 4  ;;  %s8_s11 = int_to_ptr.vmem [resolvable:$true] %s7_s11 }
   0x2   :  { %s336_s12 = scalar_lea.vmem %s8_s11, 16  ;;  %p341_p1 = scmp.lt.s32.totalorder %s8_s11, %s8_s11 }
   0x3   :  { %p337_p0 = scmp.ne.s32.totalorder %s8_s11, %s336_s12  ;;  %p342_p2 = scmp.lt.s32.totalorder %s336_s12, %s336_s12 }
   0x5   :  { %p343_p3 = por %p342_p2, %p341_p1 }
   0x7   :  { %p344_p4 = pnand %p343_p3, %p337_p0 }
   0x9   :  { %347 = shalt.err (!%p344_p4)  }
   0xa   :  { %s584_s13 = smov [#allocation5]  }
   0xb   :  { %10 = dma.vmem_to_smem %s8_s11, 16, %s584_s13, [#allocation4] }
   0xc   :  { %574 = dma.done.wait [#allocation4], 16 }
   0xd   :  { %575 = vsyncadd [#allocation4], 4294967280 }
   0xe   :  { %12 = sfence }
   0xf   :  { %13 = vsyncpa [#allocation7], 0  ;;  %s15_s14 = sld [smem:[#allocation5]]  ;;  %s585_s15 = smov [#allocation2]  }
  0x10   :  { %s25_s16 = sshll.u32 %s585_s15, 4  ;;  %s614_s17 = sld [smem:[#allocation5 + $0x1]]  ;;  %s616_s16 = int_to_ptr.vmem [resolvable:$true] %s25_s16 }
  0x11   :  { %s586_s0 = smov [#allocation2 + $0x1]   ;;  %s618_s19 = sld [smem:[#allocation5 + $0x2]] }
  0x12   :  { %s42_s18 = sshll.u32 %s586_s0, 4  ;;  %s587_s20 = smov [#allocation2 + $0x2]   ;;  %s620_s18 = int_to_ptr.vmem [resolvable:$true] %s42_s18 }
  0x13   :  { %s59_s21 = sshll.u32 %s587_s20, 4  ;;  %s622_s22 = sld [smem:[#allocation5 + $0x3]]  ;;  %s624_s21 = int_to_ptr.vmem [resolvable:$true] %s59_s21 }
  0x14   :  { %s633_s3 = scalar_lea.hbm %s775_s1, 256 }
  0x15   :  { %s286_s23 = sshll.u32 %s15_s14, 4 }
  0x16   :  { %s17_s26 = scalar_lea.hbm %s775_s1, %s286_s23  ;;  %s288_s27 = sshll.u32 %s614_s17, 4 }
  0x17   :  { %s348_s28 = scalar_lea.hbm %s17_s26, 16  ;;  %p351_p6 = scmp.lt.s32.totalorder %s17_s26, %s775_s1 }
  0x18   :  { %p349_p5 = scmp.ne.s32.totalorder %s17_s26, %s348_s28  ;;  %p352_p7 = scmp.lt.s32.totalorder %s633_s3, %s348_s28 }
  0x1a   :  { %p353_p8 = por %p352_p7, %p351_p6 }
  0x1c   :  { %p354_p9 = pnand %p353_p8, %p349_p5 }
  0x1e   :  { %357 = shalt.err (!%p354_p9)  }
  0x1f   :  { %s358_s6 = scalar_lea.vmem %s616_s16, 16  ;;  %s642_s7 = scalar_lea.vmem %s616_s16, 256 }
  0x20   :  { %p359_p10 = scmp.ne.s32.totalorder %s616_s16, %s358_s6  ;;  %p363_p11 = scmp.lt.s32.totalorder %s616_s16, %s616_s16 }
  0x21   :  { %p364_p12 = scmp.lt.s32.totalorder %s642_s7, %s358_s6 }
  0x23   :  { %p365_p13 = por %p364_p12, %p363_p11 }
  0x25   :  { %p366_p0 = pnand %p365_p13, %p359_p10 }
  0x27   :  { %369 = shalt.err (!%p366_p0)  }
  0x28   :  { %28 = dma.hbm_to_vmem [thread:$0]  %s17_s26, 16, %s616_s16, [#allocation3] }
  0x29   :  { %s32_s10 = scalar_lea.hbm %s775_s1, %s288_s27  ;;  %s290_s11 = sshll.u32 %s618_s19, 4 }
  0x2a   :  { %s370_s12 = scalar_lea.hbm %s32_s10, 16  ;;  %p373_p2 = scmp.lt.s32.totalorder %s32_s10, %s775_s1 }
  0x2b   :  { %p371_p1 = scmp.ne.s32.totalorder %s32_s10, %s370_s12  ;;  %p374_p3 = scmp.lt.s32.totalorder %s633_s3, %s370_s12 }
  0x2d   :  { %p375_p4 = por %p374_p3, %p373_p2 }
  0x2f   :  { %p376_p5 = pnand %p375_p4, %p371_p1 }
  0x31   :  { %379 = shalt.err (!%p376_p5)  }
  0x32   :  { %s380_s15 = scalar_lea.vmem %s620_s18, 16  ;;  %p385_p7 = scmp.lt.s32.totalorder %s620_s18, %s616_s16 }
  0x33   :  { %p381_p6 = scmp.ne.s32.totalorder %s620_s18, %s380_s15  ;;  %p386_p8 = scmp.lt.s32.totalorder %s642_s7, %s380_s15 }
  0x35   :  { %p387_p9 = por %p386_p8, %p385_p7 }
  0x37   :  { %p388_p10 = pnand %p387_p9, %p381_p6 }
  0x39   :  { %391 = shalt.err (!%p388_p10)  }
  0x3a   :  { %45 = dma.hbm_to_vmem [thread:$0]  %s32_s10, 16, %s620_s18, [#allocation3 + $0x1] }
  0x3b   :  { %s49_s19 = scalar_lea.hbm %s775_s1, %s290_s11  ;;  %s292_s20 = sshll.u32 %s622_s22, 4 }
  0x3c   :  { %s392_s23 = scalar_lea.hbm %s49_s19, 16  ;;  %p395_p12 = scmp.lt.s32.totalorder %s49_s19, %s775_s1 }
  0x3d   :  { %p393_p11 = scmp.ne.s32.totalorder %s49_s19, %s392_s23  ;;  %p396_p13 = scmp.lt.s32.totalorder %s633_s3, %s392_s23 }
  0x3f   :  { %p397_p0 = por %p396_p13, %p395_p12 }
  0x41   :  { %p398_p1 = pnand %p397_p0, %p393_p11 }
  0x43   :  { %401 = shalt.err (!%p398_p1)  }
  0x44   :  { %s402_s18 = scalar_lea.vmem %s624_s21, 16  ;;  %p407_p3 = scmp.lt.s32.totalorder %s624_s21, %s616_s16 }
  0x45   :  { %p403_p2 = scmp.ne.s32.totalorder %s624_s21, %s402_s18  ;;  %p408_p4 = scmp.lt.s32.totalorder %s642_s7, %s402_s18 }
  0x47   :  { %p409_p5 = por %p408_p4, %p407_p3 }
  0x49   :  { %p410_p6 = pnand %p409_p5, %p403_p2 }
  0x4b   :  { %413 = shalt.err (!%p410_p6)  }
  0x4c   :  { %62 = dma.hbm_to_vmem [thread:$0]  %s49_s19, 16, %s624_s21, [#allocation3 + $0x2] }
  0x4d   :  { %s66_s27 = scalar_lea.hbm %s775_s1, %s292_s20  ;;  %s588_s28 = smov [#allocation2 + $0x3]  }
  0x4e   :  { %s76_s29 = sshll.u32 %s588_s28, 4  ;;  %s293_s30 = sld [smem:[#allocation5 + $0x4]]  ;;  %s77_s29 = int_to_ptr.vmem [resolvable:$true] %s76_s29 }
  0x4f   :  { %s414_s4 = scalar_lea.hbm %s66_s27, 16  ;;  %p417_p8 = scmp.lt.s32.totalorder %s66_s27, %s775_s1 }
  0x50   :  { %p415_p7 = scmp.ne.s32.totalorder %s66_s27, %s414_s4  ;;  %p418_p9 = scmp.lt.s32.totalorder %s633_s3, %s414_s4 }
  0x52   :  { %p419_p10 = por %p418_p9, %p417_p8 }
  0x54   :  { %p420_p11 = pnand %p419_p10, %p415_p7 }
  0x56   :  { %423 = shalt.err (!%p420_p11)  }
  0x57   :  { %s424_s8 = scalar_lea.vmem %s77_s29, 16  ;;  %p429_p13 = scmp.lt.s32.totalorder %s77_s29, %s616_s16 }
  0x58   :  { %p425_p12 = scmp.ne.s32.totalorder %s77_s29, %s424_s8  ;;  %p430_p0 = scmp.lt.s32.totalorder %s642_s7, %s424_s8 }
  0x5a   :  { %p431_p1 = por %p430_p0, %p429_p13 }
  0x5c   :  { %p432_p2 = pnand %p431_p1, %p425_p12 }
  0x5e   :  { %435 = shalt.err (!%p432_p2)  }
  0x5f   :  { %79 = dma.hbm_to_vmem [thread:$0]  %s66_s27, 16, %s77_s29, [#allocation3 + $0x3] }
  0x60   :  { %s589_s21 = smov [#allocation2 + $0x4]   ;;  %s295_s10 = sld [smem:[#allocation5 + $0x5]] }
  0x61   :  { %s93_s9 = sshll.u32 %s589_s21, 4  ;;  %s590_s11 = smov [#allocation2 + $0x5]   ;;  %s94_s9 = int_to_ptr.vmem [resolvable:$true] %s93_s9 }
  0x62   :  { %s110_s12 = sshll.u32 %s590_s11, 4  ;;  %s685_s13 = sld [smem:[#allocation5 + $0x6]]  ;;  %s687_s12 = int_to_ptr.vmem [resolvable:$true] %s110_s12 }
  0x63   :  { %s294_s14 = sshll.u32 %s293_s30, 4 }
  0x64   :  { %s83_s0 = scalar_lea.hbm %s775_s1, %s294_s14 }
  0x65   :  { %s436_s19 = scalar_lea.hbm %s83_s0, 16  ;;  %p439_p4 = scmp.lt.s32.totalorder %s83_s0, %s775_s1 }
  0x66   :  { %p437_p3 = scmp.ne.s32.totalorder %s83_s0, %s436_s19  ;;  %p440_p5 = scmp.lt.s32.totalorder %s633_s3, %s436_s19 }
  0x68   :  { %p441_p6 = por %p440_p5, %p439_p4 }
  0x6a   :  { %p442_p7 = pnand %p441_p6, %p437_p3 }
  0x6c   :  { %445 = shalt.err (!%p442_p7)  }
  0x6d   :  { %s446_s24 = scalar_lea.vmem %s94_s9, 16  ;;  %p451_p9 = scmp.lt.s32.totalorder %s94_s9, %s616_s16 }
  0x6e   :  { %p447_p8 = scmp.ne.s32.totalorder %s94_s9, %s446_s24  ;;  %p452_p10 = scmp.lt.s32.totalorder %s642_s7, %s446_s24 }
  0x70   :  { %p453_p11 = por %p452_p10, %p451_p9 }
  0x72   :  { %p454_p12 = pnand %p453_p11, %p447_p8 }
  0x74   :  { %457 = shalt.err (!%p454_p12)  }
  0x75   :  { %96 = dma.hbm_to_vmem [thread:$0]  %s83_s0, 16, %s94_s9, [#allocation3 + $0x4] }
  0x76   :  { %s296_s25 = sshll.u32 %s295_s10, 4  ;;  %s591_s18 = smov [#allocation2 + $0x6]  }
  0x77   :  { %s127_s22 = sshll.u32 %s591_s18, 4  ;;  %s100_s28 = scalar_lea.hbm %s775_s1, %s296_s25  ;;  %s701_s22 = int_to_ptr.vmem [resolvable:$true] %s127_s22 }
  0x78   :  { %s458_s29 = scalar_lea.hbm %s100_s28, 16  ;;  %p461_p0 = scmp.lt.s32.totalorder %s100_s28, %s775_s1 }
  0x79   :  { %p459_p13 = scmp.ne.s32.totalorder %s100_s28, %s458_s29  ;;  %p462_p1 = scmp.lt.s32.totalorder %s633_s3, %s458_s29 }
  0x7b   :  { %p463_p2 = por %p462_p1, %p461_p0 }
  0x7d   :  { %p464_p3 = pnand %p463_p2, %p459_p13 }
  0x7f   :  { %467 = shalt.err (!%p464_p3)  }
  0x80   :  { %s468_s5 = scalar_lea.vmem %s687_s12, 16  ;;  %p473_p5 = scmp.lt.s32.totalorder %s687_s12, %s616_s16 }
  0x81   :  { %p469_p4 = scmp.ne.s32.totalorder %s687_s12, %s468_s5  ;;  %p474_p6 = scmp.lt.s32.totalorder %s642_s7, %s468_s5 }
  0x83   :  { %p475_p7 = por %p474_p6, %p473_p5 }
  0x85   :  { %p476_p8 = pnand %p475_p7, %p469_p4 }
  0x87   :  { %479 = shalt.err (!%p476_p8)  }
  0x88   :  { %113 = dma.hbm_to_vmem [thread:$0]  %s100_s28, 16, %s687_s12, [#allocation3 + $0x5] }
  0x89   :  { %s298_s6 = sshll.u32 %s685_s13, 4  ;;  %s299_s8 = sld [smem:[#allocation5 + $0x7]] }
  0x8a   :  { %s117_s10 = scalar_lea.hbm %s775_s1, %s298_s6 }
  0x8b   :  { %s480_s11 = scalar_lea.hbm %s117_s10, 16  ;;  %p483_p10 = scmp.lt.s32.totalorder %s117_s10, %s775_s1 }
  0x8c   :  { %p481_p9 = scmp.ne.s32.totalorder %s117_s10, %s480_s11  ;;  %p484_p11 = scmp.lt.s32.totalorder %s633_s3, %s480_s11 }
  0x8e   :  { %p485_p12 = por %p484_p11, %p483_p10 }
  0x90   :  { %p486_p13 = pnand %p485_p12, %p481_p9 }
  0x92   :  { %489 = shalt.err (!%p486_p13)  }
  0x93   :  { %s490_s12 = scalar_lea.vmem %s701_s22, 16  ;;  %p495_p1 = scmp.lt.s32.totalorder %s701_s22, %s616_s16 }
  0x94   :  { %p491_p0 = scmp.ne.s32.totalorder %s701_s22, %s490_s12  ;;  %p496_p2 = scmp.lt.s32.totalorder %s642_s7, %s490_s12 }
  0x96   :  { %p497_p3 = por %p496_p2, %p495_p1 }
  0x98   :  { %p498_p4 = pnand %p497_p3, %p491_p0 }
  0x9a   :  { %501 = shalt.err (!%p498_p4)  }
  0x9b   :  { %130 = dma.hbm_to_vmem [thread:$0]  %s117_s10, 16, %s701_s22, [#allocation3 + $0x6] }
  0x9c   :  { %s592_s13 = smov [#allocation2 + $0x7]   ;;  %s300_s0 = sshll.u32 %s299_s8, 4 }
  0x9d   :  { %s144_s17 = sshll.u32 %s592_s13, 4  ;;  %s134_s23 = scalar_lea.hbm %s775_s1, %s300_s0  ;;  %s145_s17 = int_to_ptr.vmem [resolvable:$true] %s144_s17 }
  0x9e   :  { %s502_s24 = scalar_lea.hbm %s134_s23, 16  ;;  %p505_p6 = scmp.lt.s32.totalorder %s134_s23, %s775_s1 }
  0x9f   :  { %p503_p5 = scmp.ne.s32.totalorder %s134_s23, %s502_s24  ;;  %p506_p7 = scmp.lt.s32.totalorder %s633_s3, %s502_s24 }
  0xa1   :  { %p507_p8 = por %p506_p7, %p505_p6 }
  0xa3   :  { %p508_p9 = pnand %p507_p8, %p503_p5 }
  0xa5   :  { %511 = shalt.err (!%p508_p9)  }
  0xa6   :  { %s512_s26 = scalar_lea.vmem %s145_s17, 16  ;;  %p517_p11 = scmp.lt.s32.totalorder %s145_s17, %s616_s16 }
  0xa7   :  { %p513_p10 = scmp.ne.s32.totalorder %s145_s17, %s512_s26  ;;  %p518_p12 = scmp.lt.s32.totalorder %s642_s7, %s512_s26 }
  0xa9   :  { %p519_p13 = por %p518_p12, %p517_p11 }
  0xab   :  { %p520_p0 = pnand %p519_p13, %p513_p10 }
  0xad   :  { %523 = shalt.err (!%p520_p0)  }
  0xae   :  { %147 = dma.hbm_to_vmem [thread:$0]  %s134_s23, 16, %s145_s17, [#allocation3 + $0x7] }
  0xaf   :  { %s736_s22 = smov 0  }
  0xb0 LB: > { %s156_s27 = sand.u32 7, %s582_s22  ;;  %s582_s22 = sphi %s736_s22, %s153_s22  }
  0xb1   : > { %s157_s28 = scalar_lea.sflag [#allocation3], %s156_s27 }
  0xb2   : > { %576 = dma.done.wait %s157_s28, 16 }
  0xb3   : > { %577 = vsyncadd %s157_s28, 4294967280  ;;  %s743_s29 = sadd.s32 8, %s582_s22  ;;  %s278_s5 = scalar_lea.vmem [#allocation2], %s582_s22 }
  0xb4   : > { %p315_p1 = scmp.lt.s32.totalorder %s743_s29, 16  ;;  %s279_s6 = scalar_lea.vmem %s278_s5, 8 [#allocation2] }
  0xb5   : > { %s168_s21 = sand.u32 7, %s743_s29  ;;  %s180_s9 = sshll.u32 %s279_s6, 4  ;;  %s181_s9 = int_to_ptr.vmem [resolvable:$true] %s180_s9 }
  0xb6   : > { %s312_s30 = scalar_select %p315_p1, [#allocation5], [#allocation28] }
  0xb7   : > { %s313_s4 = scalar_select %p315_p1, %s743_s29, 0 }
  0xb8   : > { %s172_s12 = scalar_lea.sflag [#allocation3], %s168_s21 }
  0xb9   : > { %s167_s8 = sld [smem:[%s312_s30 + %s313_s4]] }
  0xbf   : > { %s302_s10 = sshll.u32 %s167_s8, 4 }
  0xc0   : > { %s170_s15 = scalar_lea.hbm %s775_s1, %s302_s10 }
  0xc1   : > { %s524_s13 = scalar_lea.hbm %s170_s15, 16  ;;  %p529_p5 = scmp.lt.s32.totalorder %s170_s15, %s775_s1 }
  0xc2   : > { %p525_p2 = scmp.ne.s32.totalorder %s170_s15, %s524_s13  ;;  %p530_p6 = scmp.lt.s32.totalorder %s633_s3, %s524_s13 }
  0xc4   : > { %p526_p3 = pnand %p525_p2, %p315_p1  ;;  %p531_p7 = por %p530_p6, %p529_p5 }
  0xc6   : > { %p527_p4 = pneg %p526_p3 }
  0xc8   : > { %p532_p8 = pnand %p531_p7, %p527_p4 }
  0xca   : > { %535 = shalt.err (!%p532_p8)  }
  0xcb   : > { %s536_s19 = scalar_lea.vmem %s181_s9, 16  ;;  %p543_p12 = scmp.lt.s32.totalorder %s181_s9, %s616_s16 }
  0xcc   : > { %p537_p9 = scmp.ne.s32.totalorder %s181_s9, %s536_s19  ;;  %p544_p13 = scmp.lt.s32.totalorder %s642_s7, %s536_s19 }
  0xce   : > { %p538_p10 = pnand %p537_p9, %p315_p1  ;;  %p545_p0 = por %p544_p13, %p543_p12 }
  0xd0   : > { %p539_p11 = pneg %p538_p10 }
  0xd2   : > { %p546_p2 = pnand %p545_p0, %p539_p11 }
  0xd4   : > { %549 = shalt.err (!%p546_p2)  }
  0xd5   : > { %314 = dma.hbm_to_vmem [thread:$0]  (%p315_p1), %s170_s15, 16, %s181_s9, %s172_s12 }
  0xd6   : > { %s153_s22 = sadd.s32 1, %s582_s22  }
  0xd7   : > { %p150_p3 = scmp.ge.s32.totalorder %s153_s22, 16  }
  0xd8   :  { %v184_v0 = vld [vmem:[#allocation2] sm:$0xff] (%p150_p3)  ;;  %v185_v1 = vld [vmem:[#allocation2 + $0x8] sm:$0xff] (%p150_p3)  ;;  %s593_s20 = smov (%p150_p3), [#allocation6]  }
  0xd9   :  { %152 = sbr.rel (!%p150_p3) target bundleno = 176 (0xb0), region = 100  ;;  %186 = vst [vmem:[#allocation6] sm:$0xff] (%p150_p3), %v184_v0  ;;  %187 = vst [vmem:[#allocation6 + $0x8] sm:$0xff] (%p150_p3), %v185_v1  ;;  %s193_s23 = sshll.u32 (%p150_p3), %s593_s20, 4  ;;  %s194_s23 = int_to_ptr.vmem [resolvable:$true] %s193_s23 }
  0xda   :  { %s550_s24 = scalar_lea.vmem (%p150_p3), %s194_s23, 256  ;;  %p555_p5 = scmp.lt.s32.totalorder (%p150_p3), %s194_s23, %s194_s23 }
  0xdb   :  { %p551_p4 = scmp.ne.s32.totalorder (%p150_p3), %s194_s23, %s550_s24  ;;  %p556_p6 = scmp.lt.s32.totalorder (%p150_p3), %s550_s24, %s550_s24 }
  0xdd   :  { %p557_p7 = por (%p150_p3), %p556_p6, %p555_p5 }
  0xdf   :  { %p558_p8 = pnand %p557_p7, %p551_p4 }
  0xe1   :  { %561 = shalt.err (!%p558_p8)
}
  0xe2   :  { %s594_s25 = smov 128   ;;  %s595_s18 = smov 8  }
  0xe3   :  { %199 = dma.vmem_to_hbm [thread:$0]  %s194_s23, 256, %s776_s2, [#allocation7], %s594_s25, %s594_s25, %s595_s18  }
  0xe4   :  { %578 = dma.done.wait [#allocation7], 256  }
  0xe5   :  { %579 = vsyncadd [#allocation7], 4294967040 }
  0xe6   :  { %203 = vsyncpa [#allocation7], 1 }
  0xe7   :  { %204 = vsyncmov [#allocation3] }
  0xea   :  { %s205_s1 = vpop.sfrf %204 }
  0xeb   :  { %p303_p1 = scmp.ne.s32.totalorder %s205_s1, 0 }
  0xed   :  { %209 = shalt.err (%p303_p1)  }
  0xee   :  { %211 = vsyncmov [#allocation3 + $0x1] }
  0xf1   :  { %s212_s16 = vpop.sfrf %211 }
  0xf2   :  { %p304_p9 = scmp.ne.s32.totalorder %s212_s16, 0 }
  0xf4   :  { %216 = shalt.err (%p304_p9)  }
  0xf5   :  { %218 = vsyncmov [#allocation3 + $0x2] }
  0xf8   :  { %s219_s3 = vpop.sfrf %218 }
  0xf9   :  { %p305_p10 = scmp.ne.s32.totalorder %s219_s3, 0 }
  0xfb   :  { %223 = shalt.err (%p305_p10)  }
  0xfc   :  { %225 = vsyncmov [#allocation3 + $0x3] }
  0xff   :  { %s226_s7 = vpop.sfrf %225 }
 0x100   :  { %p306_p11 = scmp.ne.s32.totalorder %s226_s7, 0 }
 0x102   :  { %230 = shalt.err (%p306_p11)  }
 0x103   :  { %232 = vsyncmov [#allocation3 + $0x4] }
 0x106   :  { %s233_s2 = vpop.sfrf %232 }
 0x107   :  { %p307_p12 = scmp.ne.s32.totalorder %s233_s2, 0 }
 0x109   :  { %237 = shalt.err (%p307_p12)  }
 0x10a   :  { %239 = vsyncmov [#allocation3 + $0x5] }
 0x10d   :  { %s240_s22 = vpop.sfrf %239 }
 0x10e   :  { %p308_p13 = scmp.ne.s32.totalorder %s240_s22, 0 }
 0x110   :  { %244 = shalt.err (%p308_p13)  }
 0x111   :  { %246 = vsyncmov [#allocation3 + $0x6] }
 0x114   :  { %s247_s28 = vpop.sfrf %246 }
 0x115   :  { %p309_p0 = scmp.ne.s32.totalorder %s247_s28, 0 }
 0x117   :  { %251 = shalt.err (%p309_p0)  }
 0x118   :  { %253 = vsyncmov [#allocation3 + $0x7] }
 0x11b   :  { %s254_s29 = vpop.sfrf %253 }
 0x11c   :  { %p310_p2 = scmp.ne.s32.totalorder %s254_s29, 0 }
 0x11e   :  { %258 = shalt.err (%p310_p2)  }

</bundles_post_ra>
